<compile_context>
chip_gen: v6e
topology: v6e:2x2x1
jax: 0.10.0
libtpu: 0.0.40
codegen_flags: <defaults>
</compile_context>

<pallas_src>
import math
import functools

import jax
import jax.numpy as jnp
from jax.experimental import pallas as pl
from jax.experimental.pallas import tpu as pltpu


_MAX_ROWS = 2048               # hard cap on seq-rows per tile
_TARGET_TILE_BYTES = 2 << 20   # ~2 MiB per operand buffer
_MIN_GRID_STEPS = 8            # keep the DMA pipeline / dual-TC busy


# ---------------------------------------------------------------------------
# Kernels
# ---------------------------------------------------------------------------

def _pos_enc_kernel(x_ref, pe_ref, o_ref, *, scale):
    # x_ref : (tb, S, D) or (1, rows, D) tile of the embedding
    # pe_ref: (1, S, D) / (1, rows, D) / (1, 1, D)  -- broadcasts in the add
    emb = x_ref[...].astype(jnp.float32) * scale + pe_ref[...].astype(jnp.float32)
    o_ref[...] = emb.astype(o_ref.dtype)


def _pos_enc_dropout_kernel(x_ref, pe_ref, keep_ref, o_ref, *, scale, inv_keep):
    emb = x_ref[...].astype(jnp.float32) * scale + pe_ref[...].astype(jnp.float32)
    keep = keep_ref[...].astype(jnp.float32)      # 0.0 / 1.0 keep mask (uint8 input)
    o_ref[...] = (emb * keep * inv_keep).astype(o_ref.dtype)


# ---------------------------------------------------------------------------
# Tiling helpers
# ---------------------------------------------------------------------------

def _round_down(x, m):
    return (x // m) * m


def _round_up(x, m):
    return -(-x // m) * m


def _sublane_multiple(itemsize, with_mask):
    base = {4: 8, 2: 16, 1: 32}.get(itemsize, 8)
    # uint8 keep mask wants 32-row alignment; 32 is also valid for f32/bf16.
    return 32 if with_mask else base


def _choose_row_tile(seq_len, batch, dim, itemsize, *, sublane):
    """Row tile for the seq-tiled path: big (~2 MiB), dtype-aligned, and small
    enough that B * num_seq_tiles gives a usefully deep grid."""
    bytes_per_row = max(1, dim * itemsize)
    rows = _TARGET_TILE_BYTES // bytes_per_row
    rows = max(sublane, min(rows, _MAX_ROWS))
    rows = min(rows, _round_up(seq_len, sublane))

    def n_steps(r):
        return batch * pl.cdiv(seq_len, r)

    while rows > sublane and n_steps(rows) < _MIN_GRID_STEPS:
        rows = max(sublane, _round_down(rows // 2, sublane))
    rows = max(sublane, _round_down(rows, sublane))
    return rows


def _choose_batch_tile(batch, seq_len, dim, itemsize):
    """Batch tile for the small-S / decode path."""
    seq_bytes = max(1, seq_len * dim * itemsize)
    tb = max(1, _TARGET_TILE_BYTES // seq_bytes)
    tb = min(tb, batch)
    desired_steps = min(_MIN_GRID_STEPS, batch)
    tb = max(1, min(tb, pl.cdiv(batch, desired_steps)))
    return tb


# ---------------------------------------------------------------------------
# Module
# ---------------------------------------------------------------------------

class PositionalEncodingPallas:
    # Below this many bytes of S*D, tile over batch instead of sequence.
    batch_tile_threshold_bytes = 1 << 20

    def __init__(self, dropout: float, dim: int, max_len: int = 5000):
        self.p = float(dropout)
        self.dim = int(dim)
        self.max_len = int(max_len)

        # Deterministic parameter init (same math as the PyTorch __init__).
        position = jnp.arange(0, max_len, dtype=jnp.float32)[:, None]          # (max_len, 1)
        div_term = jnp.exp(
            jnp.arange(0, dim, 2, dtype=jnp.float32) * -(math.log(10000.0) / dim)
        )                                                                       # (dim//2,)
        pe = jnp.zeros((max_len, dim), dtype=jnp.float32)
        pe = pe.at[:, 0::2].set(jnp.sin(position * div_term))
        pe = pe.at[:, 1::2].set(jnp.cos(position * div_term))
        self.pe = pe                                                            # (max_len, dim) f32

        # Padded copy so any row-tile of the seq-tiled path stays in bounds,
        # letting the kernel index straight into the cached cast array
        # (no per-call slice+cast pass).
        self._pe_padded = jnp.pad(pe, ((0, _MAX_ROWS), (0, 0)))                # (max_len+pad, dim)
        self._pe_cache = {}                                                     # dtype -> (1, L, D)

    def _pe_for_dtype(self, dtype):
        key = jnp.dtype(dtype).name
        if key not in self._pe_cache:
            self._pe_cache[key] = self._pe_padded.astype(dtype)[None]           # (1, L, D)
        return self._pe_cache[key]

    def __call__(self, embedding: jax.Array, step=None, seed: int = 0) -> jax.Array:
        B, S, D = embedding.shape
        assert D == self.dim
        dtype = embedding.dtype
        itemsize = jnp.dtype(dtype).itemsize
        with_dropout = self.p > 0.0
        scale = math.sqrt(self.dim)

        pe_full = self._pe_for_dtype(dtype)                       # cached cast, (1, L, D)

        # NOTE: PyTorch's forward uses `if step:` which treats step == 0 like the
        # training path (a bug flagged in review); we use `is not None` so decoding
        # at position 0 correctly adds pe[0].
        decode = step is not None
        if decode:
            pe_row = pe_full[:, step:step + 1]                    # (1, 1, D)

        # ---- dropout mask (host-side jax.random; see module docstring) -----
        if with_dropout:
            keep_prob = 1.0 - self.p
            keep = jax.random.bernoulli(
                jax.random.PRNGKey(seed), keep_prob, (B, S, D)
            ).astype(jnp.uint8)                                   # 0/1, 1 byte/elem
            kernel = functools.partial(
                _pos_enc_dropout_kernel, scale=scale, inv_keep=float(1.0 / keep_prob))
        else:
            keep = None
            kernel = functools.partial(_pos_enc_kernel, scale=scale)

        # ---- choose tiling mode --------------------------------------------
        seq_bytes = S * D * itemsize
        batch_tiled = decode or seq_bytes <= self.batch_tile_threshold_bytes or S == 1

        if batch_tiled:
            # One lane/sublane-dense (tb, S, D) block per grid step; pe block has a
            # constant index so it is DMA'd once and stays resident.
            if decode:
                pe_block = pe_row                                  # (1, 1, D)
            else:
                pe_block = pe_full[:, :S]                          # (1, S, D), small by construction
            tb = _choose_batch_tile(B, S, D, itemsize)
            grid = (pl.cdiv(B, tb),)
            x_spec = pl.BlockSpec((tb, S, D), lambda i: (i, 0, 0))
            pe_spec = pl.BlockSpec(pe_block.shape, lambda i: (0, 0, 0))
            out_spec = pl.BlockSpec((tb, S, D), lambda i: (i, 0, 0))
            mask_spec = pl.BlockSpec((tb, S, D), lambda i: (i, 0, 0))
            dim_sem = ("parallel",)
        else:
            # Seq-tiled: grid (num_seq_tiles, B) with batch innermost so the pe tile's
            # block index is unchanged across consecutive steps -> fetched once per
            # seq tile instead of once per (seq tile, batch element).
            sublane = _sublane_multiple(itemsize, with_dropout)
            rows = _choose_row_tile(S, B, D, itemsize, sublane=sublane)
            grid = (pl.cdiv(S, rows), B)
            if decode:
                pe_block = pe_row                                  # (1, 1, D) broadcast over seq
                pe_spec = pl.BlockSpec((1, 1, D), lambda s, b: (0, 0, 0))
            else:
                pe_block = pe_full                                 # only requested tiles are DMA'd
                pe_spec = pl.BlockSpec((1, rows, D), lambda s, b: (0, s, 0))
            x_spec = pl.BlockSpec((1, rows, D), lambda s, b: (b, s, 0))
            out_spec = pl.BlockSpec((1, rows, D), lambda s, b: (b, s, 0))
            mask_spec = pl.BlockSpec((1, rows, D), lambda s, b: (b, s, 0))
            dim_sem = ("parallel", "arbitrary")

        in_specs = [x_spec, pe_spec]
        inputs = [embedding, pe_block]
        if with_dropout:
            in_specs.append(mask_spec)
            inputs.append(keep)

        # ---- cost hint (pe counted once thanks to the reuse fix) ------------
        pe_bytes = (1 if decode else S) * D * itemsize
        io_bytes = 2 * B * S * D * itemsize + pe_bytes
        flops = 2 * B * S * D
        if with_dropout:
            io_bytes += B * S * D                                  # uint8 keep mask
            flops += B * S * D
        cost = pl.CostEstimate(flops=flops, transcendentals=0, bytes_accessed=io_bytes)

        return pl.pallas_call(
            kernel,
            out_shape=jax.ShapeDtypeStruct((B, S, D), dtype),
            grid=grid,
            in_specs=in_specs,
            out_specs=out_spec,
            compiler_params=pltpu.CompilerParams(dimension_semantics=dim_sem),
            cost_estimate=cost,
        )(*inputs)


# ---------------------------------------------------------------------------
# Self-test
# ---------------------------------------------------------------------------

if __name__ == "__main__":
    key = jax.random.PRNGKey(0)
    B, S, D = 2, 16, 128
    x = jax.random.normal(key, (B, S, D), dtype=jnp.float32)

    # 1) p = 0 training path (batch-tiled), exact check vs. reference.
    module = PositionalEncodingPallas(dropout=0.0, dim=D, max_len=64)
    out = jax.block_until_ready(module(x))
    ref = x * math.sqrt(D) + module.pe[:S][None, :, :]
    assert out.shape == (B, S, D)
    assert jnp.allclose(out, ref, atol=1e-5, rtol=1e-5)

    # 2) Decode (`step`) path: single pe row broadcast over batch and seq.
    out_step = jax.block_until_ready(module(x, step=3))
    ref_step = x * math.sqrt(D) + module.pe[3][None, None, :]
    assert jnp.allclose(out_step, ref_step, atol=1e-5, rtol=1e-5)

    # 3) bf16 fast path (f32 math in-kernel, cast at the store).
    out_bf16 = jax.block_until_ready(module(x.astype(jnp.bfloat16)))
    assert out_bf16.dtype == jnp.bfloat16
    assert jnp.allclose(out_bf16.astype(jnp.float32), ref, atol=0.5, rtol=0.05)

    # 4) Dropout path (batch-tiled): exact check against the same jax.random mask.
    module_p = PositionalEncodingPallas(dropout=0.25, dim=D, max_len=64)
    out_p = jax.block_until_ready(module_p(x, seed=7))
    keep_ref = jax.random.bernoulli(jax.random.PRNGKey(7), 0.75, (B, S, D))
    ref_p = (x * math.sqrt(D) + module_p.pe[:S][None]) * keep_ref / 0.75
    assert jnp.allclose(out_p, ref_p, atol=1e-4, rtol=1e-4)

    # 5) Seq-tiled path (large-S regime), exercised at a small shape by lowering
    #    the batch-tile threshold; S2 chosen so the last tile is partial.
    S2 = 200
    module_seq = PositionalEncodingPallas(dropout=0.0, dim=D, max_len=512)
    module_seq.batch_tile_threshold_bytes = 4 << 10
    x2 = jax.random.normal(jax.random.PRNGKey(1), (B, S2, D), dtype=jnp.float32)
    out2 = jax.block_until_ready(module_seq(x2))
    ref2 = x2 * math.sqrt(D) + module_seq.pe[:S2][None]
    assert jnp.allclose(out2, ref2, atol=1e-5, rtol=1e-5)

    # 6) Seq-tiled path with dropout (uint8 mask tiles, 32-row alignment).
    module_seq_p = PositionalEncodingPallas(dropout=0.5, dim=D, max_len=512)
    module_seq_p.batch_tile_threshold_bytes = 4 << 10
    out2_p = jax.block_until_ready(module_seq_p(x2, seed=11))
    keep2 = jax.random.bernoulli(jax.random.PRNGKey(11), 0.5, (B, S2, D))
    ref2_p = (x2 * math.sqrt(D) + module_seq_p.pe[:S2][None]) * keep2 / 0.5
    assert jnp.allclose(out2_p, ref2_p, atol=1e-4, rtol=1e-4)

    print("KERNEL_OK")
</pallas_src>

<mosaic_0001>
module attributes {stable_mosaic.version = 11 : i64} {
  func.func @_pos_enc_kernel(%arg0: i32, %arg1: memref<1x16x128xf32, #tpu.memory_space<vmem>>, %arg2: memref<1x16x128xf32, #tpu.memory_space<vmem>>, %arg3: memref<1x16x128xf32, #tpu.memory_space<vmem>>) attributes {dimension_semantics = [#tpu.dimension_semantics<parallel>], iteration_bounds = array<i64: 2>, scalar_prefetch = 0 : i64, scratch_operands = 0 : i64, tpu.core_type = #tpu.core_type<tc>, window_params = [{transform_indices = @transform_0, window_bounds = array<i64: 1, 16, 128>}, {pipeline_mode = #tpu.pipeline_mode<synchronous>, transform_indices = @transform_1, window_bounds = array<i64: 1, 16, 128>}, {transform_indices = @transform_2, window_bounds = array<i64: 1, 16, 128>}]} {
    %c0 = arith.constant 0 : index
    %c0_0 = arith.constant 0 : index
    %c0_1 = arith.constant 0 : index
    %0 = vector.load %arg1[%c0, %c0_0, %c0_1] : memref<1x16x128xf32, #tpu.memory_space<vmem>>, vector<1x16x128xf32>
    %cst = arith.constant 11.3137083 : f32
    %1 = vector.broadcast %cst : f32 to vector<1x16x128xf32>
    %2 = arith.mulf %0, %1 : vector<1x16x128xf32>
    %c0_2 = arith.constant 0 : index
    %c0_3 = arith.constant 0 : index
    %c0_4 = arith.constant 0 : index
    %3 = vector.load %arg2[%c0_2, %c0_3, %c0_4] : memref<1x16x128xf32, #tpu.memory_space<vmem>>, vector<1x16x128xf32>
    %4 = arith.addf %2, %3 : vector<1x16x128xf32>
    %c0_5 = arith.constant 0 : index
    %c0_6 = arith.constant 0 : index
    %c0_7 = arith.constant 0 : index
    %5 = vector.load %arg3[%c0_5, %c0_6, %c0_7] : memref<1x16x128xf32, #tpu.memory_space<vmem>>, vector<1x16x128xf32>
    tpu.vector_store %arg3[%c0_5, %c0_6, %c0_7], %4 {strides = array<i32>} : memref<1x16x128xf32, #tpu.memory_space<vmem>>, vector<1x16x128xf32>,
    return
  }
  func.func @transform_0(%arg0: i32) -> (i32, i32, i32) {
    %c0_i32 = arith.constant 0 : i32
    %c0_i32_0 = arith.constant 0 : i32
    %c0_i32_1 = arith.constant 0 : i32
    return %arg0, %c0_i32, %c0_i32_0 : i32, i32, i32
  }
  func.func @transform_1(%arg0: i32) -> (i32, i32, i32) {
    %c0_i32 = arith.constant 0 : i32
    %c0_i32_0 = arith.constant 0 : i32
    %c0_i32_1 = arith.constant 0 : i32
    %c0_i32_2 = arith.constant 0 : i32
    return %c0_i32, %c0_i32_0, %c0_i32_1 : i32, i32, i32
  }
  func.func @transform_2(%arg0: i32) -> (i32, i32, i32) {
    %c0_i32 = arith.constant 0 : i32
    %c0_i32_0 = arith.constant 0 : i32
    %c0_i32_1 = arith.constant 0 : i32
    return %arg0, %c0_i32, %c0_i32_0 : i32, i32, i32
  }
}

</mosaic_0001>

<bundles_post_ra>
// kernel: tpu_custom_call.1
= control target key start
LH: loop header
LB: loop body
LE: loop exit
PB: predicated region body
PF: predicated region fallthrough
CT: control target
= control target key end

     0   :  { %7 = vsyncpa [#allocation3], 0  ;;  %s692_s0 = inlined_call_operand.hbm [shape: f32[2,16,128], index: 0, kind: input, shape index: {}]   ;;  %s693_s1 = inlined_call_operand.hbm [shape: f32[1,16,128], index: 1, kind: input, shape index: {}]   ;;  %s694_s2 = inlined_call_operand.hbm [shape: f32[2,16,128], index: 2, kind: output, shape index: {}]  }
   0x1   :  { %9 = vsyncpa [#allocation3 + $0x1], 0 }
   0x2   :  { %10 = vsyncpa [#allocation6], 0 }
   0x3   :  { %11 = vsyncpa [#allocation4], 0 }
   0x4   :  { %13 = vsyncpa [#allocation4 + $0x1], 0  ;;  %s509_s9 = smov 0   ;;  %s511_s10 = smov 0  }
   0x5   :  { %s513_s11 = smov 0   ;;  %s515_s12 = smov 0  }
   0x6 LB: > { %s530_s13 = sadd.s32 4294967295, %s485_s12   ;;  %s284_s14 = sadd.s32 4294967294, %s485_s12   ;;  %s485_s12 = sphi %s515_s12, %s716_s12   ;;  %s481_s11 = sphi %s513_s11, %s715_s11   ;;  %s477_s10 = sphi %s511_s10, %s714_s10   ;;  %s473_s9 = sphi %s509_s9, %s713_s9  }
   0x7   : > { %p39_p0 = scmp.ne.s32.totalorder %s477_s10, %s473_s9  ;;  %p695_p1 = scmp.eq.s32.totalorder %s530_s13, 0 }
   0x8   : > { %p90_p3 = scmp.eq.s32.totalorder %s284_s14, 1  ;;  %p285_p5 = scmp.ge.s32.totalorder %s485_s12, 1 }
   0x9   : > { %p539_p4 = por %p695_p1, %p39_p0  ;;  %p97_p7 = scmp.lt.s32.totalorder %s485_s12, 3 }
   0xa   : > { %p544_p6 = por %p90_p3, %p39_p0  ;;  %s487_s18 = smov [#allocation5]  }
   0xb   : > { %s699_s15 = scalar_select %p539_p4, 1, 0 }
   0xc   : > { %s700_s16 = scalar_select %p544_p6, 1, 0 }
   0xd   : > { %p549_p8 = pnand %p285_p5, %p97_p7  ;;  %s109_s19 = sshll.u32 %s487_s18, 4  ;;  %s110_s19 = int_to_ptr.vmem [resolvable:$true] %s109_s19 }
   0xe   : > { %s563_s21 = sadd.s32 1, %s485_s12   ;;  %s26_s22 = sadd.s32 1, %s481_s11 }
   0xf   : > { %s701_s17 = scalar_select %p549_p8, 1, 0 }
  0x10   : > { %p310_p9 = pneg %p549_p8  ;;  %s23_s23 = ssub.s32 %s485_s12, %s563_s21 }
  0x11   : > { %s374_s24 = scalar_lea.vmem %s110_s19, 256  ;;  %p382_p5 = scmp.lt.s32.totalorder %s110_s19, %s110_s19 }
  0x12   : > { %p558_p11 = pnand %p310_p9, %p695_p1  ;;  %p375_p13 = scmp.ne.s32.totalorder %s110_s19, %s374_s24 }
  0x13   : > { %p383_p7 = scmp.lt.s32.totalorder %s374_s24, %s374_s24 }
  0x14   : > { %p365_p12 = pneg %p558_p11 }
  0x15   : > { %p384_p10 = por %p383_p7, %p382_p5 }
  0x16   : > { %p377_p0 = pnand %p375_p13, %p365_p12 }
  0x18   : > { %p378_p3 = pneg %p377_p0 }
  0x1a   : > { %p385_p2 = pnand %p384_p10, %p378_p3 }
  0x1c   : > { %388 = shalt.err (!%p385_p2)
}
  0x1d   : > { %s488_s25 = smov 128   ;;  %s489_s26 = smov 8  }
  0x1e   : > { %313 = dma.hbm_to_vmem [thread:$0]  (!%p558_p11), %s693_s1, 256, %s110_s19, [#allocation6], %s488_s25, %s488_s25, %s489_s26  }
  0x1f   : > { %p24_p2 = scmp.eq.s32.totalorder %s23_s23, 0  ;;  %p33_p9 = scmp.ne.s32.totalorder %s481_s11, %s477_s10 }
  0x20   : > { %p34_p10 = scmp.eq.s32.totalorder %s485_s12, 0  ;;  %p323_p12 = scmp.lt.s32.totalorder %s485_s12, 2 }
  0x21   : > { %s583_s29 = scalar_select %p24_p2, %s481_s11, %s26_s22  }
  0x22   : > { %p35_p13 = por %p34_p10, %p33_p9  ;;  %p703_p0 = scmp.eq.s32.totalorder %s530_s13, 1 }
  0x23   : > { %s123_s3 = sand.u32 1, %s481_s11   ;;  %s300_s4 = sshll.u32 %s485_s12, 8 }
  0x24   : > { %p587_p3 = por %p703_p0, %p33_p9  ;;  %s288_s5 = sshll.u32 %s123_s3, 4 }
  0x25   : > { %s596_s8 = scalar_lea.hbm %s692_s0, %s300_s4  ;;  %s127_s14 = scalar_lea.vmem [#allocation2], %s288_s5 }
  0x26   : > { %s704_s30 = scalar_select %p587_p3, 1, 0 }
  0x27   : > { %s134_s18 = sshll.u32 %s127_s14, 4  ;;  %p598_p11 = pnand %p323_p12, %p35_p13  ;;  %s602_s18 = int_to_ptr.vmem [resolvable:$true] %s134_s18 }
  0x28   : > { %s604_s20 = scalar_lea.sflag [#allocation3], %s123_s3  ;;  %s389_s22 = scalar_lea.hbm %s596_s8, 256 }
  0x29   : > { %p390_p5 = scmp.ne.s32.totalorder %s596_s8, %s389_s22  ;;  %p391_p7 = pneg %p598_p11 }
  0x2a   : > { %s394_s27 = scalar_lea.hbm %s692_s0, 512  ;;  %p395_p10 = scmp.lt.s32.totalorder %s596_s8, %s692_s0 }
  0x2b   : > { %p392_p2 = pnand %p391_p7, %p390_p5  ;;  %p396_p12 = scmp.lt.s32.totalorder %s394_s27, %s389_s22 }
  0x2d   : > { %p393_p9 = pneg %p392_p2  ;;  %p397_p13 = por %p396_p12, %p395_p10 }
  0x2f   : > { %p398_p0 = pnand %p397_p13, %p393_p9 }
  0x31   : > { %401 = shalt.err (!%p398_p0)
}
  0x32   : > { %s402_s3 = scalar_lea.vmem %s602_s18, 256  ;;  %s490_s5 = smov [#allocation2]  }
  0x33   : > { %p403_p1 = scmp.ne.s32.totalorder %s602_s18, %s402_s3  ;;  %s407_s6 = sshll.u32 %s490_s5, 4  ;;  %s408_s6 = int_to_ptr.vmem [resolvable:$false] %s407_s6 }
  0x34   : > { %s409_s7 = scalar_lea.vmem %s408_s6, 512  ;;  %p410_p2 = scmp.lt.s32.totalorder %s602_s18, %s408_s6 }
  0x35   : > { %p405_p6 = pnand %p403_p1, %p391_p7  ;;  %p411_p3 = scmp.lt.s32.totalorder %s409_s7, %s402_s3 }
  0x37   : > { %p406_p5 = pneg %p405_p6  ;;  %p412_p4 = por %p411_p3, %p410_p2 }
  0x39   : > { %p413_p8 = pnand %p412_p4, %p406_p5 }
  0x3b   : > { %416 = shalt.err (!%p413_p8)
}
  0x3c   : > { %317 = dma.hbm_to_vmem [thread:$0]  (!%p598_p11), %s596_s8, 256, %s602_s18, %s604_s20, %s488_s25, %s488_s25, %s489_s26  }
  0x3d   : > { %p706_p1 = scmp.ne.s32.totalorder %s701_s17, 0 }
  0x3e   : > { %s631_s14 = sand.u32 (!%p706_p1), 1, %s477_s10   ;;  %p707_p4 = scmp.ne.s32.totalorder (!%p706_p1), %s699_s15, 0 }
  0x3f   : > { %146 = sbr.rel (%p706_p1) target bundleno = 98 (0x62), region = 28  ;;  %s292_s22 = sshll.u32 (!%p706_p1), %s631_s14, 4 }
  0x40   : > { %s149_s23 = scalar_lea.sflag (!%p706_p1), [#allocation3], %s631_s14  ;;  %s152_s24 = scalar_lea.vmem (!%p706_p1), [#allocation2], %s292_s22 }
  0x44   : > { %460 = dma.done.wait (%p707_p4), %s149_s23, 256  }
  0x45   : > { %462 = vsyncadd (%p707_p4), %s149_s23, 4294967040  ;;  %p708_p6 = scmp.eq.s32.totalorder %s530_s13, 0 }
  0x47   : > { %464 = dma.done.wait (%p708_p6), [#allocation6], 256   ;;  %p709_p8 = pmov %p708_p6 }
  0x48   : > { %s176_s17 = scalar_lea.vmem [#allocation7], %s292_s22  ;;  %s301_s26 = sshll.u32 %s530_s13, 8  ;;  %v177_v0 = vld [vmem:[%s152_s24] sm:$0xff]  ;;  %v178_v2 = vld [vmem:[%s152_s24 + $0x8] sm:$0xff] }
  0x49   : > { %466 = vsyncadd (%p709_p8), [#allocation6], 4294967040  ;;  %s201_s25 = sshll.u32 %s176_s17, 4  ;;  %v181_v1 = vld [vmem:[#allocation5] sm:$0xff]  ;;  %v179_v3 = vmul.f32 11.313708, %v177_v0  ;;  %s649_s18 = scalar_lea.hbm %s694_s2, %s301_s26  ;;  %s644_s25 = int_to_ptr.vmem [resolvable:$true] %s201_s25 }
  0x4a   : > { %v180_v4 = vmul.f32 11.313708, %v178_v2  ;;  %v182_v5 = vld [vmem:[#allocation5 + $0x8] sm:$0xff]  ;;  %s188_s13 = scalar_lea.sflag [#allocation4], %s631_s14  ;;  %s417_s19 = scalar_lea.vmem %s644_s25, 256 }
  0x4b   : > { %v183_v6 = vadd.f32 %v181_v1, %v179_v3  ;;  %p418_p3 = scmp.ne.s32.totalorder %s644_s25, %s417_s19  ;;  %p710_p11 = scmp.ne.s32.totalorder %s704_s30, 0 }
  0x4c   : > { %v184_v7 = vadd.f32 %v182_v5, %v180_v4  ;;  %s491_s20 = smov [#allocation7]  }
  0x4d   : > { %185 = vst [vmem:[%s176_s17] sm:$0xff] %v183_v6  ;;  %p419_p7 = pnand %p418_p3, %p710_p11  ;;  %s421_s27 = sshll.u32 %s491_s20, 4  ;;  %s422_s27 = int_to_ptr.vmem [resolvable:$false] %s421_s27 }
  0x4e   : > { %186 = vst [vmem:[%s176_s17 + $0x8] sm:$0xff] %v184_v7  ;;  %s423_s28 = scalar_lea.vmem %s422_s27, 512  ;;  %p424_p10 = scmp.lt.s32.totalorder %s644_s25, %s422_s27 }
  0x4f   : > { %p420_p9 = pneg %p419_p7  ;;  %p425_p12 = scmp.lt.s32.totalorder %s423_s28, %s417_s19 }
  0x51   : > { %p426_p13 = por %p425_p12, %p424_p10 }
  0x53   : > { %p427_p0 = pnand %p426_p13, %p420_p9 }
  0x55   : > { %430 = shalt.err (!%p427_p0)
}
  0x56   : > { %s431_s4 = scalar_lea.hbm %s649_s18, 256  ;;  %s435_s6 = scalar_lea.hbm %s694_s2, 512 }
  0x57   : > { %p432_p5 = scmp.ne.s32.totalorder %s649_s18, %s431_s4  ;;  %p436_p4 = scmp.lt.s32.totalorder %s649_s18, %s694_s2 }
  0x58   : > { %p437_p6 = scmp.lt.s32.totalorder %s435_s6, %s431_s4 }
  0x59   : > { %p433_p2 = pnand %p432_p5, %p710_p11 }
  0x5a   : > { %p438_p8 = por %p437_p6, %p436_p4 }
  0x5b   : > { %p434_p1 = pneg %p433_p2 }
  0x5d   : > { %p439_p3 = pnand %p438_p8, %p434_p1 }
  0x5f   : > { %442 = shalt.err (!%p439_p3)
}
  0x60   : > { %s492_s23 = smov 128   ;;  %s493_s24 = smov 8  }
  0x61   : > { %308 = dma.vmem_to_hbm [thread:$0]  (%p710_p11), %s644_s25, 256, %s649_s18, %s188_s13, %s492_s23, %s492_s23, %s493_s24  }
  0x62 PF: > { %s216_s17 = sand.u32 1, %s473_s9   ;;  %p711_p7 = scmp.ne.s32.totalorder %s700_s16, 0 }
  0x63   : > { %p712_p9 = scmp.ge.s32.totalorder %s485_s12, 2  ;;  %s217_s26 = scalar_lea.sflag [#allocation4], %s216_s17 }
  0x65   : > { %p319_p10 = pnand %p712_p9, %p711_p7 }
  0x67   : > { %p320_p12 = pneg %p319_p10 }
  0x69   : > { %468 = dma.done.wait (%p320_p12), %s217_s26, 256  }
  0x6a   : > { %470 = vsyncadd (%p320_p12), %s217_s26, 4294967040  ;;  %p16_p13 = scmp.ge.s32.totalorder %s563_s21, 4   ;;  %s713_s9 = smov %s477_s10 }
  0x6b   : > { %s714_s10 = smov %s481_s11  ;;  %s715_s11 = smov %s583_s29 }
  0x6c   : > { %s716_s12 = smov %s563_s21  ;;  %18 = sbr.rel (!%p16_p13) target bundleno = 6 (0x6), region = 77 }
  0x71   :  { %222 = vsyncpa [#allocation3], 1 }
  0x72   :  { %224 = vsyncpa [#allocation3 + $0x1], 1 }
  0x73   :  { %225 = vsyncpa [#allocation6], 1 }
  0x74   :  { %226 = vsyncpa [#allocation4], 1 }
  0x75   :  { %228 = vsyncpa [#allocation4 + $0x1], 1 }

</bundles_post_ra>
